<compile_context>
chip_gen: v5e
topology: v5e:2x2
jax: 0.10.0
libtpu: 0.0.40
codegen_flags: <defaults>
</compile_context>

<pallas_src>
import functools

import jax
import jax.numpy as jnp
from jax import lax
from jax.experimental import pallas as pl
from jax.experimental.pallas import tpu as pltpu

_LANE = 128
_SUBLANE = 8
_CHUNK_ROWS = 512  # rows (of 128 lanes) per inner accumulation chunk (f32 ~256 KiB)


def _sublane_pack(dtype):
    """Native sublane packing factor for the input dtype."""
    return {4: 8, 2: 16, 1: 32}.get(jnp.dtype(dtype).itemsize, 8)


# --------------------------------------------------------------------------
# Main path: D % 128 == 0  ->  per-sample lane-dense (R, 128) slabs.
# --------------------------------------------------------------------------
def _l2_slab_kernel(x_ref, y_ref, o_ref, acc_ref, *, bn, tile_r, total_r, ragged):
    """Blocks: x/y (bn, tile_r, 128); o (bn, 1, 1); acc scratch (bn, 8, 128) f32."""
    r = pl.program_id(1)
    last = pl.num_programs(1) - 1

    @pl.when(r == 0)
    def _():
        acc_ref[...] = jnp.zeros_like(acc_ref)

    def accum_rows(start, size, masked):
        # Accumulate rows [start, start+size) of this block into the (8,128) slab.
        xs = x_ref[:, pl.ds(start, size), :].astype(jnp.float32)
        ys = y_ref[:, pl.ds(start, size), :].astype(jnp.float32)
        dd = xs - ys
        if masked:  # only emitted for the last (ragged) r block
            row = lax.broadcasted_iota(jnp.int32, (bn, size, _LANE), 1)
            glob = row + (r * tile_r + start)
            dd = jnp.where(glob < total_r, dd, 0.0)
        d2 = dd * dd
        if size % _SUBLANE == 0:
            # Layout-preserving split of the sublane-major axis -> pure VPU adds.
            part = jnp.sum(d2.reshape(bn, size // _SUBLANE, _SUBLANE, _LANE), axis=1)
            acc_ref[...] += part
        else:
            # size < 8 rows (single tiny block); rows 1..7 of acc stay zero.
            acc_ref[:, 0:1, :] += jnp.sum(d2, axis=1, keepdims=True)

    n_chunks = tile_r // _CHUNK_ROWS
    rem = tile_r - n_chunks * _CHUNK_ROWS

    def run(masked):
        if n_chunks > 0:
            @pl.loop(0, n_chunks)
            def _(c):
                start = pl.multiple_of(c * _CHUNK_ROWS, _CHUNK_ROWS)
                accum_rows(start, _CHUNK_ROWS, masked)
        if rem > 0:
            accum_rows(n_chunks * _CHUNK_ROWS, rem, masked)

    if ragged:
        @pl.when(r != last)
        def _():
            run(False)          # clean fast path for full blocks

        @pl.when(r == last)
        def _():
            run(True)           # mask only the ragged tail block
    else:
        run(False)

    @pl.when(r == last)
    def _():
        # Finalize in-kernel: (bn, 8, 128) slab -> one f32 per sample.
        s = jnp.sum(acc_ref[...], axis=2, keepdims=True)   # lane reduce -> (bn, 8, 1)
        o_ref[...] = jnp.sum(s, axis=1, keepdims=True)      # sublane reduce -> (bn, 1, 1)


def _l2_slab(x, y, n, d, max_block_bytes):
    itemsize = jnp.dtype(x.dtype).itemsize
    pack = _sublane_pack(x.dtype)
    r_total = d // _LANE
    row_bytes = _LANE * itemsize
    sample_bytes = r_total * row_bytes

    # v7x megacore: if N == 1 and the sample spans many blocks, split its rows
    # into 2 virtual samples so the "parallel" batch axis has work for both TCs.
    split = 1
    n_eff, r_eff = n, r_total
    if n == 1 and sample_bytes > max_block_bytes and r_total % 2 == 0:
        split = 2
        n_eff, r_eff = 2, r_total // 2

    xf = x.reshape(n_eff, r_eff, _LANE)   # free reshape of contiguous data
    yf = y.reshape(n_eff, r_eff, _LANE)

    sample_bytes = r_eff * row_bytes
    if n_eff * sample_bytes <= max_block_bytes:
        bn, tile_r = n_eff, r_eff                       # whole problem in one block
    elif sample_bytes <= max_block_bytes:
        bn = min(n_eff, max(1, max_block_bytes // sample_bytes))
        tile_r = r_eff                                  # several whole samples / block
    else:
        bn = 1
        max_rows = max(pack, (max_block_bytes // row_bytes) // pack * pack)
        tile_r = min(r_eff, max_rows)                   # dtype-aligned row tile

    grid_b = pl.cdiv(n_eff, bn)
    grid_r = pl.cdiv(r_eff, tile_r)
    ragged = (r_eff % tile_r) != 0

    block_bytes = bn * tile_r * row_bytes
    vmem_limit = int(min(48 << 20, max(16 << 20, 4 * block_bytes + (8 << 20))))

    kernel = functools.partial(
        _l2_slab_kernel, bn=bn, tile_r=tile_r, total_r=r_eff, ragged=ragged)

    out = pl.pallas_call(
        kernel,
        out_shape=jax.ShapeDtypeStruct((n_eff, 1, 1), jnp.float32),
        grid_spec=pltpu.PrefetchScalarGridSpec(
            num_scalar_prefetch=0,
            grid=(grid_b, grid_r),
            in_specs=[
                pl.BlockSpec((bn, tile_r, _LANE), lambda b, r: (b, r, 0)),
                pl.BlockSpec((bn, tile_r, _LANE), lambda b, r: (b, r, 0)),
            ],
            out_specs=pl.BlockSpec((bn, 1, 1), lambda b, r: (b, 0, 0)),
            scratch_shapes=[pltpu.VMEM((bn, _SUBLANE, _LANE), jnp.float32)],
        ),
        compiler_params=pltpu.CompilerParams(
            dimension_semantics=("parallel", "arbitrary"),
            vmem_limit_bytes=vmem_limit,
        ),
    )(xf, yf)

    res = out[:, 0, 0]                       # (n_eff,)
    if split > 1:
        res = res.reshape(n, split).sum(axis=1)
    return res


# --------------------------------------------------------------------------
# Tiny path: D < 128  ->  single block, one trivial reduce.
# --------------------------------------------------------------------------
def _l2_tiny_kernel(x_ref, y_ref, o_ref):
    dd = x_ref[...].astype(jnp.float32) - y_ref[...].astype(jnp.float32)
    o_ref[...] = jnp.sum(dd * dd, axis=1, keepdims=True)


def _l2_tiny(x, y, n, d):
    xf = x.reshape(n, d)
    yf = y.reshape(n, d)
    out = pl.pallas_call(
        _l2_tiny_kernel,
        out_shape=jax.ShapeDtypeStruct((n, 1), jnp.float32),
        grid_spec=pltpu.PrefetchScalarGridSpec(
            num_scalar_prefetch=0,
            grid=(1,),
            in_specs=[
                pl.BlockSpec((n, d), lambda i: (0, 0)),
                pl.BlockSpec((n, d), lambda i: (0, 0)),
            ],
            out_specs=pl.BlockSpec((n, 1), lambda i: (0, 0)),
        ),
        compiler_params=pltpu.CompilerParams(
            dimension_semantics=("arbitrary",)),
    )(xf, yf)
    return out[:, 0]


# --------------------------------------------------------------------------
# Fallback path: D >= 128 and D % 128 != 0 (no padding; mask only last block).
# --------------------------------------------------------------------------
def _l2_flat_kernel(x_ref, y_ref, o_ref, *, n, n_grp, tile_d, total_d):
    """Blocks: x/y (n, tile_d) with tile_d = n_grp*128; o (n, 128) resident."""
    k = pl.program_id(0)
    last = pl.num_programs(0) - 1

    @pl.when(k == 0)
    def _():
        o_ref[...] = jnp.zeros_like(o_ref)

    def run(masked):
        acc = None
        for g in range(n_grp):          # static, lane-aligned 128-column slices
            lo = g * _LANE
            xg = x_ref[:, lo:lo + _LANE].astype(jnp.float32)
            yg = y_ref[:, lo:lo + _LANE].astype(jnp.float32)
            dd = xg - yg
            if masked:
                col = lax.broadcasted_iota(jnp.int32, (n, _LANE), 1) + (k * tile_d + lo)
                dd = jnp.where(col < total_d, dd, 0.0)
            p = dd * dd
            acc = p if acc is None else acc + p
        o_ref[...] += acc               # lane-dense (n, 128) accumulate, VPU only

    @pl.when(k != last)
    def _():
        run(False)

    @pl.when(k == last)
    def _():
        run(True)


def _l2_flat(x, y, n, d, max_block_bytes):
    itemsize = jnp.dtype(x.dtype).itemsize
    xf = x.reshape(n, d)
    yf = y.reshape(n, d)

    full_groups = d // _LANE                                 # >= 1 here
    bytes_per_group = n * _LANE * itemsize
    cap_by_bytes = max(1, (4 << 20) // bytes_per_group)      # <= ~4 MiB per input block
    n_grp = max(1, min(full_groups, 64, cap_by_bytes))       # bounded static unroll
    tile_d = n_grp * _LANE                                   # <= d, multiple of 128
    grid_d = pl.cdiv(d, tile_d)                              # >= 2 since d % 128 != 0

    block_bytes = n * tile_d * itemsize
    vmem_limit = int(min(48 << 20, max(16 << 20, 4 * block_bytes + (8 << 20))))

    kernel = functools.partial(
        _l2_flat_kernel, n=n, n_grp=n_grp, tile_d=tile_d, total_d=d)

    out = pl.pallas_call(
        kernel,
        out_shape=jax.ShapeDtypeStruct((n, _LANE), jnp.float32),
        grid_spec=pltpu.PrefetchScalarGridSpec(
            num_scalar_prefetch=0,
            grid=(grid_d,),
            in_specs=[
                pl.BlockSpec((n, tile_d), lambda k: (0, k)),
                pl.BlockSpec((n, tile_d), lambda k: (0, k)),
            ],
            out_specs=pl.BlockSpec((n, _LANE), lambda k: (0, 0)),
        ),
        compiler_params=pltpu.CompilerParams(
            dimension_semantics=("arbitrary",),
            vmem_limit_bytes=vmem_limit,
        ),
    )(xf, yf)
    return jnp.sum(out, axis=1)   # tiny epilogue: 128-lane reduce per sample


# --------------------------------------------------------------------------
# Public wrapper (matches the PyTorch L2.forward semantics).
# --------------------------------------------------------------------------
def l2_pallas(x, y, *, max_block_bytes=8 * 1024 * 1024):
    """Computes sum((x - y)**2) over all non-batch dims. x, y: (N, ...)."""
    assert x.shape == y.shape, "x and y must have identical shapes"
    n = x.shape[0]
    d = 1
    for s in x.shape[1:]:
        d *= s
    out_dtype = jnp.promote_types(x.dtype, y.dtype)

    if n == 0 or d == 0:
        return jnp.zeros((n,), out_dtype)

    if d % _LANE == 0:
        res = _l2_slab(x, y, n, d, max_block_bytes)
    elif d < _LANE:
        res = _l2_tiny(x, y, n, d)
    else:
        res = _l2_flat(x, y, n, d, max_block_bytes)
    return res.astype(out_dtype)


if __name__ == "__main__":
    key = jax.random.PRNGKey(0)
    kx, ky = jax.random.split(key)

    N, C, H, W = 2, 4, 16, 16
    x = jax.random.normal(kx, (N, C, H, W), dtype=jnp.float32)
    y = jax.random.normal(ky, (N, C, H, W), dtype=jnp.float32)

    out = jax.block_until_ready(l2_pallas(x, y))

    # Reference check (plain JAX).
    ref = jnp.sum((x - y) ** 2, axis=(1, 2, 3))
    assert out.shape == (N,)
    assert jnp.allclose(out, ref, rtol=1e-5, atol=1e-5), (out, ref)

    print("KERNEL_OK")
</pallas_src>

<mosaic_0001>
module attributes {stable_mosaic.version = 11 : i64} {
  func.func @_l2_slab_kernel(%arg0: i32, %arg1: i32, %arg2: memref<2x8x128xf32, #tpu.memory_space<vmem>>, %arg3: memref<2x8x128xf32, #tpu.memory_space<vmem>>, %arg4: memref<2x1x1xf32, #tpu.memory_space<vmem>>, %arg5: memref<2x8x128xf32, #tpu.memory_space<vmem>>) attributes {dimension_semantics = [#tpu.dimension_semantics<parallel>, #tpu.dimension_semantics<arbitrary>], iteration_bounds = array<i64: 1, 1>, scalar_prefetch = 0 : i64, scratch_operands = 1 : i64, tpu.core_type = #tpu.core_type<tc>, window_params = [{transform_indices = @transform_0, window_bounds = array<i64: 2, 8, 128>}, {transform_indices = @transform_1, window_bounds = array<i64: 2, 8, 128>}, {transform_indices = @transform_2, window_bounds = array<i64: 2, 1, 1>}]} {
    %c0_i32 = arith.constant 0 : i32
    %0 = arith.cmpi eq, %arg1, %c0_i32 : i32
    %1 = arith.extui %0 : i1 to i32
    %c0_i32_0 = arith.constant 0 : i32
    %2 = arith.cmpi ne, %1, %c0_i32_0 : i32
    scf.if %2 {
      %cst_14 = arith.constant 0.000000e+00 : f32
      %15 = vector.broadcast %cst_14 : f32 to vector<2x8x128xf32>
      %c0_15 = arith.constant 0 : index
      %c0_16 = arith.constant 0 : index
      %c0_17 = arith.constant 0 : index
      %16 = vector.load %arg5[%c0_15, %c0_16, %c0_17] : memref<2x8x128xf32, #tpu.memory_space<vmem>>, vector<2x8x128xf32>
      tpu.vector_store %arg5[%c0_15, %c0_16, %c0_17], %15 {strides = array<i32>} : memref<2x8x128xf32, #tpu.memory_space<vmem>>, vector<2x8x128xf32>,
    } else {
    }
    %c0 = arith.constant 0 : index
    %c0_1 = arith.constant 0 : index
    %c0_2 = arith.constant 0 : index
    %3 = vector.load %arg2[%c0, %c0_1, %c0_2] : memref<2x8x128xf32, #tpu.memory_space<vmem>>, vector<2x8x128xf32>
    %c0_3 = arith.constant 0 : index
    %c0_4 = arith.constant 0 : index
    %c0_5 = arith.constant 0 : index
    %4 = vector.load %arg3[%c0_3, %c0_4, %c0_5] : memref<2x8x128xf32, #tpu.memory_space<vmem>>, vector<2x8x128xf32>
    %5 = arith.subf %3, %4 : vector<2x8x128xf32>
    %6 = arith.mulf %5, %5 : vector<2x8x128xf32>
    %7 = vector.shape_cast %6 : vector<2x8x128xf32> to vector<2x1x8x128xf32>
    %cst = arith.constant dense<0.000000e+00> : vector<2x8x128xf32>
    %8 = vector.multi_reduction <add>, %7, %cst [1] : vector<2x1x8x128xf32> to vector<2x8x128xf32>
    %c0_6 = arith.constant 0 : index
    %c0_7 = arith.constant 0 : index
    %c0_8 = arith.constant 0 : index
    %9 = vector.load %arg5[%c0_6, %c0_7, %c0_8] : memref<2x8x128xf32, #tpu.memory_space<vmem>>, vector<2x8x128xf32>
    %10 = arith.addf %9, %8 : vector<2x8x128xf32>
    %c0_9 = arith.constant 0 : index
    %c0_10 = arith.constant 0 : index
    %c0_11 = arith.constant 0 : index
    %11 = vector.load %arg5[%c0_9, %c0_10, %c0_11] : memref<2x8x128xf32, #tpu.memory_space<vmem>>, vector<2x8x128xf32>
    tpu.vector_store %arg5[%c0_9, %c0_10, %c0_11], %10 {strides = array<i32>} : memref<2x8x128xf32, #tpu.memory_space<vmem>>, vector<2x8x128xf32>,
    %c0_i32_12 = arith.constant 0 : i32
    %12 = arith.cmpi eq, %arg1, %c0_i32_12 : i32
    %13 = arith.extui %12 : i1 to i32
    %c0_i32_13 = arith.constant 0 : i32
    %14 = arith.cmpi ne, %13, %c0_i32_13 : i32
    scf.if %14 {
      %c0_14 = arith.constant 0 : index
      %c0_15 = arith.constant 0 : index
      %c0_16 = arith.constant 0 : index
      %15 = vector.load %arg5[%c0_14, %c0_15, %c0_16] : memref<2x8x128xf32, #tpu.memory_space<vmem>>, vector<2x8x128xf32>
      %cst_17 = arith.constant dense<0.000000e+00> : vector<2x8xf32>
      %16 = vector.multi_reduction <add>, %15, %cst_17 [2] : vector<2x8x128xf32> to vector<2x8xf32>
      %17 = vector.shape_cast %16 : vector<2x8xf32> to vector<2x8x1xf32>
      %cst_18 = arith.constant dense<0.000000e+00> : vector<2x1xf32>
      %18 = vector.multi_reduction <add>, %17, %cst_18 [1] : vector<2x8x1xf32> to vector<2x1xf32>
      %19 = vector.shape_cast %18 : vector<2x1xf32> to vector<2x1x1xf32>
      %c0_19 = arith.constant 0 : index
      %c0_20 = arith.constant 0 : index
      %c0_21 = arith.constant 0 : index
      %20 = vector.load %arg4[%c0_19, %c0_20, %c0_21] : memref<2x1x1xf32, #tpu.memory_space<vmem>>, vector<2x1x1xf32>
      tpu.vector_store %arg4[%c0_19, %c0_20, %c0_21], %19 {strides = array<i32>} : memref<2x1x1xf32, #tpu.memory_space<vmem>>, vector<2x1x1xf32>,
    } else {
    }
    return
  }
  func.func @transform_0(%arg0: i32, %arg1: i32) -> (i32, i32, i32) {
    %c0_i32 = arith.constant 0 : i32
    %c0_i32_0 = arith.constant 0 : i32
    return %arg0, %arg1, %c0_i32 : i32, i32, i32
  }
  func.func @transform_1(%arg0: i32, %arg1: i32) -> (i32, i32, i32) {
    %c0_i32 = arith.constant 0 : i32
    %c0_i32_0 = arith.constant 0 : i32
    return %arg0, %arg1, %c0_i32 : i32, i32, i32
  }
  func.func @transform_2(%arg0: i32, %arg1: i32) -> (i32, i32, i32) {
    %c0_i32 = arith.constant 0 : i32
    %c0_i32_0 = arith.constant 0 : i32
    %c0_i32_1 = arith.constant 0 : i32
    return %arg0, %c0_i32, %c0_i32_0 : i32, i32, i32
  }
}

</mosaic_0001>

<bundles_post_ra>
// kernel: tpu_custom_call.1
= control target key start
LH: loop header
LB: loop body
LE: loop exit
PB: predicated region body
PF: predicated region fallthrough
CT: control target
= control target key end

     0   :  { %7 = vsyncpa [#allocation4], 0  ;;  %s182_s0 = inlined_call_operand.hbm [shape: f32[2,8,128], index: 0, kind: input, shape index: {}]   ;;  %s183_s1 = inlined_call_operand.hbm [shape: f32[2,8,128], index: 1, kind: input, shape index: {}]   ;;  %s184_s2 = inlined_call_operand.vmem [shape: f32[2,1,1], index: 2, kind: output, shape index: {}]  }
   0x1   :  { %s13_s11 = sshll.u32 %s182_s0, 4  ;;  %s14_s11 = int_to_ptr.hbm [resolvable:$true] %s13_s11 }
   0x2   :  { %8 = vsyncpa [#allocation6], 0  ;;  %s151_s12 = smov [#allocation3]   ;;  %s26_s16 = sshll.u32 %s183_s1, 4  ;;  %s27_s16 = int_to_ptr.hbm [resolvable:$true] %s26_s16 }
   0x3   :  { %s15_s13 = sshll.u32 %s151_s12, 4  ;;  %s152_s17 = smov 128   ;;  %s16_s13 = int_to_ptr.vmem [resolvable:$true] %s15_s13 }
   0x4   :  { %s153_s18 = smov 8   ;;  %s154_s19 = smov [#allocation5]  }
   0x5   :  { %21 = dma.hbm_to_vmem [thread:$0]  %s14_s11, 256, %s16_s13, [#allocation4], %s152_s17, %s152_s17, %s153_s18  }
   0x6   :  { %s28_s20 = sshll.u32 %s154_s19, 4  ;;  %s29_s20 = int_to_ptr.vmem [resolvable:$true] %s28_s20 }
   0x7   :  { %34 = dma.hbm_to_vmem [thread:$0]  %s27_s16, 256, %s29_s20, [#allocation6], %s152_s17, %s152_s17, %s153_s18  }
   0x8   :  { %147 = dma.done.wait [#allocation4], 256  }
   0x9   :  { %148 = vsyncadd [#allocation4], 4294967040 }
   0xa   :  { %149 = dma.done.wait [#allocation6], 256  }
   0xb   :  { %150 = vsyncadd [#allocation6], 4294967040  ;;  %v49_v0 = vld [vmem:[#allocation3] sm:$0xff]  ;;  %v51_v1 = vld [vmem:[#allocation5] sm:$0xff]  ;;  %vm86_vm0 = vcmask 0  }
   0xc   :  { %v53_v2 = vsub.f32 %v49_v0, %v51_v1  ;;  %v50_v3 = vld [vmem:[#allocation3 + $0x8] sm:$0xff]  ;;  %v52_v4 = vld [vmem:[#allocation5 + $0x8] sm:$0xff] }
   0xd   :  { %v54_v6 = vsub.f32 %v50_v3, %v52_v4 }
   0xe   :  { %v55_v5 = vmul.f32 %v53_v2, %v53_v2 }
   0xf   :  { %v56_v7 = vmul.f32 %v54_v6, %v54_v6 }
  0x10   :  { %70 = vadd.xlane.f32.xlu0 %v55_v5 }
  0x18   :  { %72 = vadd.xlane.f32.xlu0 %v56_v7 }
  0x83   :  { %v71_v8 = vpop.xlane.xlu0 %70 }
  0x84   :  { %v74_v9 = vrot.slane %v71_v8, 4 }
  0x86   :  { %v75_v10 = vadd.f32 %v74_v9, %v71_v8 }
  0x88   :  { %v76_v11 = vrot.slane %v75_v10, 2 }
  0x8a   :  { %v77_v12 = vadd.f32 %v76_v11, %v75_v10 }
  0x8b   :  { %v73_v13 = vpop.xlane.xlu0 %72 }
  0x8c   :  { %v78_v14 = vrot.slane %v77_v12, 1  ;;  %v80_v15 = vrot.slane %v73_v13, 4 }
  0x8e   :  { %v79_v16 = vadd.f32 %v78_v14, %v77_v12  ;;  %v81_v17 = vadd.f32 %v80_v15, %v73_v13 }
  0x90   :  { %87 = vst.msk [vmem:[%s184_s2] sm:$0x1] %vm86_vm0, %v79_v16  ;;  %v82_v18 = vrot.slane %v81_v17, 2 }
  0x92   :  { %v83_v19 = vadd.f32 %v82_v18, %v81_v17 }
  0x94   :  { %v84_v20 = vrot.slane %v83_v19, 1 }
  0x96   :  { %v85_v21 = vadd.f32 %v84_v20, %v83_v19 }
  0x98   :  { %88 = vst.msk [vmem:[%s184_s2 + $0x1] sm:$0x1] %vm86_vm0, %v85_v21 }
  0x99   :  { %93 = vsyncpa [#allocation4], 1 }
  0x9a   :  { %94 = vsyncpa [#allocation6], 1 }

</bundles_post_ra>
